<compile_context>
chip_gen: v7x
topology: tpu7x:2x2x1
jax: 0.10.0
libtpu: 0.0.40
codegen_flags: <defaults>
</compile_context>

<pallas_src>
import jax
import jax.numpy as jnp
from jax.experimental import pallas as pl
from jax.experimental.pallas import tpu as pltpu


def _ffn_kernel(x_ref, wi_ref, wo_ref, o_ref):
    # x_ref : (tm, d_model)    VMEM tile of tokens
    # wi_ref: (d_ff, d_model)  torch Linear layout (contract on d_model)
    # wo_ref: (d_half, d_ff)   torch Linear layout (contract on d_ff)
    # o_ref : (tm, d_half)
    # x @ Wi^T  -> (tm, d_ff), f32 accumulation on the MXU.
    h = jax.lax.dot_general(
        x_ref[...], wi_ref[...],
        dimension_numbers=(((1,), (1,)), ((), ())),
        preferred_element_type=jnp.float32)
    h = jnp.maximum(h, 0.0)  # ReLU (SwitchTransformers dense_act_fn default)
    # dropout: identity in eval mode.
    # relu(h) @ Wo^T -> (tm, d_half), f32 accumulation.
    o = jax.lax.dot_general(
        h.astype(wo_ref.dtype), wo_ref[...],
        dimension_numbers=(((1,), (1,)), ((), ())),
        preferred_element_type=jnp.float32)
    o_ref[...] = o.astype(o_ref.dtype)


def _round_up(x, m):
    return (x + m - 1) // m * m


def pba_dense_act_dense_half_output(
    hidden_states, wi_weight, wo_weight, *,
    tm=256,
    compute_dtype=jnp.bfloat16,
    vmem_limit_bytes=48 * 1024 * 1024,
):
    """hidden_states: [B, S, d_model]
       wi_weight:     [d_ff, d_model]       (torch Linear layout)
       wo_weight:     [d_model//2, d_ff]    (torch Linear layout)
       returns:       [B, S, d_model//2] in hidden_states.dtype
    """
    B, S, d_model = hidden_states.shape
    d_ff, d_model_w = wi_weight.shape
    d_half, d_ff_w = wo_weight.shape
    assert d_model_w == d_model and d_ff_w == d_ff

    out_dtype = hidden_states.dtype
    M = B * S
    x2d = hidden_states.reshape(M, d_model)

    # Cast to the MXU compute dtype first so any padding copy is narrow.
    if compute_dtype is not None:
        x2d = x2d.astype(compute_dtype)
        wi = wi_weight.astype(compute_dtype)
        wo = wo_weight.astype(compute_dtype)
    else:
        wi, wo = wi_weight, wo_weight

    # Effective token tile: large (MXU-filling) but never bigger than the
    # 8-row-aligned token count; then pad tokens so the grid is exact.
    tm_eff = min(tm, _round_up(M, 8))
    M_pad = _round_up(M, tm_eff)
    if M_pad != M:
        x2d = jnp.pad(x2d, ((0, M_pad - M), (0, 0)))

    out2d = pl.pallas_call(
        _ffn_kernel,
        out_shape=jax.ShapeDtypeStruct((M_pad, d_half), out_dtype),
        grid_spec=pltpu.PrefetchScalarGridSpec(
            num_scalar_prefetch=0,
            grid=(M_pad // tm_eff,),
            in_specs=[
                pl.BlockSpec((tm_eff, d_model), lambda i: (i, 0)),
                # Constant index_map -> weights fetched once, stay resident.
                pl.BlockSpec((d_ff, d_model), lambda i: (0, 0)),
                pl.BlockSpec((d_half, d_ff), lambda i: (0, 0)),
            ],
            out_specs=pl.BlockSpec((tm_eff, d_half), lambda i: (i, 0)),
        ),
        compiler_params=pltpu.CompilerParams(
            dimension_semantics=("parallel",),
            vmem_limit_bytes=vmem_limit_bytes),
    )(x2d, wi, wo)

    if M_pad != M:
        out2d = out2d[:M]
    return out2d.reshape(B, S, d_half)


def reference(hidden_states, wi_weight, wo_weight, compute_dtype=None):
    """Pure-JAX reference mimicking the kernel's dtype strategy."""
    x, wi, wo = hidden_states, wi_weight, wo_weight
    if compute_dtype is not None:
        x = x.astype(compute_dtype)
        wi = wi.astype(compute_dtype)
        wo = wo.astype(compute_dtype)
    h = jax.lax.dot_general(
        x, wi, (((x.ndim - 1,), (1,)), ((), ())),
        precision=jax.lax.Precision.HIGHEST,
        preferred_element_type=jnp.float32)
    h = jnp.maximum(h, 0.0)
    if compute_dtype is not None:
        h = h.astype(compute_dtype)
    o = jax.lax.dot_general(
        h, wo, (((h.ndim - 1,), (1,)), ((), ())),
        precision=jax.lax.Precision.HIGHEST,
        preferred_element_type=jnp.float32)
    return o.astype(hidden_states.dtype)


if __name__ == "__main__":
    key = jax.random.PRNGKey(0)

    # ---- Test 1: lane-dense dims (d_half multiple of 128), default bf16 path.
    B, S = 2, 8
    d_model, d_ff = 256, 512
    d_half = d_model // 2
    k1, k2, k3, key = jax.random.split(key, 4)
    x = jax.random.normal(k1, (B, S, d_model), dtype=jnp.float32)
    wi = jax.random.normal(k2, (d_ff, d_model), dtype=jnp.float32) * 0.05
    wo = jax.random.normal(k3, (d_half, d_ff), dtype=jnp.float32) * 0.05

    out = pba_dense_act_dense_half_output(x, wi, wo)  # bf16 MXU, f32 accum
    out = jax.block_until_ready(out)
    ref = reference(x, wi, wo, compute_dtype=jnp.bfloat16)
    assert out.shape == (B, S, d_half)
    assert jnp.allclose(out, ref, atol=2e-2, rtol=2e-2), "bf16 path mismatch"

    # ---- Test 2: toy module dims + ragged token count, f32 path.
    B2, S2 = 2, 9
    dm2, dff2 = 32, 64
    dh2 = dm2 // 2
    k4, k5, k6, key = jax.random.split(key, 4)
    x2 = jax.random.normal(k4, (B2, S2, dm2), dtype=jnp.float32)
    wi2 = jax.random.normal(k5, (dff2, dm2), dtype=jnp.float32) * 0.05
    wo2 = jax.random.normal(k6, (dh2, dff2), dtype=jnp.float32) * 0.05

    out2 = pba_dense_act_dense_half_output(x2, wi2, wo2, compute_dtype=None)
    out2 = jax.block_until_ready(out2)
    ref2 = reference(x2, wi2, wo2, compute_dtype=None)
    assert out2.shape == (B2, S2, dh2)
    assert jnp.allclose(out2, ref2, atol=2e-3, rtol=2e-3), "f32 path mismatch"

    print("KERNEL_OK")
</pallas_src>

<mosaic_0001>
module attributes {stable_mosaic.version = 11 : i64} {
  func.func @_ffn_kernel(%arg0: i32, %arg1: memref<16x256xbf16, #tpu.memory_space<vmem>>, %arg2: memref<512x256xbf16, #tpu.memory_space<vmem>>, %arg3: memref<128x512xbf16, #tpu.memory_space<vmem>>, %arg4: memref<16x128xf32, #tpu.memory_space<vmem>>) attributes {dimension_semantics = [#tpu.dimension_semantics<parallel>], iteration_bounds = array<i64: 1>, scalar_prefetch = 0 : i64, scratch_operands = 0 : i64, tpu.core_type = #tpu.core_type<tc>, window_params = [{transform_indices = @transform_0, window_bounds = array<i64: 16, 256>}, {pipeline_mode = #tpu.pipeline_mode<synchronous>, transform_indices = @transform_1, window_bounds = array<i64: 512, 256>}, {pipeline_mode = #tpu.pipeline_mode<synchronous>, transform_indices = @transform_2, window_bounds = array<i64: 128, 512>}, {transform_indices = @transform_3, window_bounds = array<i64: 16, 128>}]} {
    %c0 = arith.constant 0 : index
    %c0_0 = arith.constant 0 : index
    %0 = vector.load %arg1[%c0, %c0_0] : memref<16x256xbf16, #tpu.memory_space<vmem>>, vector<16x256xbf16>
    %c0_1 = arith.constant 0 : index
    %c0_2 = arith.constant 0 : index
    %1 = vector.load %arg2[%c0_1, %c0_2] : memref<512x256xbf16, #tpu.memory_space<vmem>>, vector<512x256xbf16>
    %cst = arith.constant dense<0.000000e+00> : vector<16x512xf32>
    %2 = tpu.matmul %0, %1, %cst {dimension_numbers = #tpu.dot_dimension_numbers<[1], [1], [0], [0], [0, 0, 1, 0], [], []>} : vector<16x256xbf16>, vector<512x256xbf16>, vector<16x512xf32> -> vector<16x512xf32>
    %cst_3 = arith.constant 0.000000e+00 : f32
    %3 = vector.broadcast %cst_3 : f32 to vector<16x512xf32>
    %4 = arith.maximumf %2, %3 : vector<16x512xf32>
    %5 = arith.truncf %4 : vector<16x512xf32> to vector<16x512xbf16>
    %c0_4 = arith.constant 0 : index
    %c0_5 = arith.constant 0 : index
    %6 = vector.load %arg3[%c0_4, %c0_5] : memref<128x512xbf16, #tpu.memory_space<vmem>>, vector<128x512xbf16>
    %cst_6 = arith.constant dense<0.000000e+00> : vector<16x128xf32>
    %7 = tpu.matmul %5, %6, %cst_6 {dimension_numbers = #tpu.dot_dimension_numbers<[1], [1], [0], [0], [0, 0, 1, 0], [], []>} : vector<16x512xbf16>, vector<128x512xbf16>, vector<16x128xf32> -> vector<16x128xf32>
    %c0_7 = arith.constant 0 : index
    %c0_8 = arith.constant 0 : index
    %8 = vector.load %arg4[%c0_7, %c0_8] : memref<16x128xf32, #tpu.memory_space<vmem>>, vector<16x128xf32>
    tpu.vector_store %arg4[%c0_7, %c0_8], %7 {strides = array<i32>} : memref<16x128xf32, #tpu.memory_space<vmem>>, vector<16x128xf32>,
    return
  }
  func.func @transform_0(%arg0: i32) -> (i32, i32) {
    %c0_i32 = arith.constant 0 : i32
    %c0_i32_0 = arith.constant 0 : i32
    return %arg0, %c0_i32 : i32, i32
  }
  func.func @transform_1(%arg0: i32) -> (i32, i32) {
    %c0_i32 = arith.constant 0 : i32
    %c0_i32_0 = arith.constant 0 : i32
    %c0_i32_1 = arith.constant 0 : i32
    return %c0_i32, %c0_i32_0 : i32, i32
  }
  func.func @transform_2(%arg0: i32) -> (i32, i32) {
    %c0_i32 = arith.constant 0 : i32
    %c0_i32_0 = arith.constant 0 : i32
    %c0_i32_1 = arith.constant 0 : i32
    return %c0_i32, %c0_i32_0 : i32, i32
  }
  func.func @transform_3(%arg0: i32) -> (i32, i32) {
    %c0_i32 = arith.constant 0 : i32
    %c0_i32_0 = arith.constant 0 : i32
    return %arg0, %c0_i32 : i32, i32
  }
}

</mosaic_0001>

<bundles_post_ra>
// kernel: tpu_custom_call.1
= control target key start
LH: loop header
LB: loop body
LE: loop exit
PB: predicated region body
PF: predicated region fallthrough
CT: control target
= control target key end

     0   :  { %8 = vsyncpa [#allocation3], 0  ;;  %s1286_s0 = inlined_call_operand.hbm [shape: bf16[16,256], index: 0, kind: input, shape index: {}]   ;;  %s1287_s1 = inlined_call_operand.hbm [shape: bf16[512,256], index: 1, kind: input, shape index: {}]   ;;  %s1288_s2 = inlined_call_operand.hbm [shape: bf16[128,512], index: 2, kind: input, shape index: {}]   ;;  %s1289_s3 = inlined_call_operand.hbm [shape: f32[16,128], index: 3, kind: output, shape index: {}]  }
   0x1   :  { %9 = vsyncpa [#allocation6], 0 }
   0x2   :  { %10 = vsyncpa [#allocation4], 0  ;;  %s1194_s12 = smov [#allocation5]   ;;  %s1195_s14 = smov [#allocation2]  }
   0x3   :  { %s28_s13 = sshll.u32 %s1194_s12, 4  ;;  %s16_s15 = sshll.u32 %s1195_s14, 4  ;;  %s29_s13 = int_to_ptr.vmem [resolvable:$true] %s28_s13  ;;  %s1222_s15 = int_to_ptr.vmem [resolvable:$true] %s16_s15 }
   0x4   :  { %s1100_s18 = scalar_lea.hbm %s1287_s1, 8192 }
   0x5   :  { %p1101_p0 = scmp.ne.s32.totalorder %s1287_s1, %s1100_s18  ;;  %p1104_p1 = scmp.lt.u32.totalorder %s1100_s18, %s1287_s1 }
   0x7   :  { %p1106_p2 = pnand %p1104_p1, %p1101_p0 }
   0x9   :  { %1109 = shalt.err (!%p1106_p2)
}
   0xa   :  { %s1110_s23 = scalar_lea.vmem %s29_s13, 8192  ;;  %p1115_p4 = scmp.lt.s32.totalorder %s29_s13, %s29_s13 }
   0xb   :  { %p1111_p3 = scmp.ne.s32.totalorder %s29_s13, %s1110_s23  ;;  %p1116_p5 = scmp.lt.s32.totalorder %s1110_s23, %s1110_s23 }
   0xd   :  { %p1117_p6 = por %p1116_p5, %p1115_p4 }
   0xf   :  { %p1118_p7 = pnand %p1117_p6, %p1111_p3 }
  0x11   :  { %1121 = shalt.err (!%p1118_p7)
}
  0x12   :  { %s1196_s24 = smov 128   ;;  %s1197_s25 = smov 8  }
  0x13   :  { %34 = dma.hbm_to_vmem [thread:$0]  %s1287_s1, 8192, %s29_s13, [#allocation6], %s1196_s24, %s1196_s24, %s1197_s25  }
  0x14   :  { %s1122_s30 = scalar_lea.hbm %s1286_s0, 256 }
  0x15   :  { %p1123_p8 = scmp.ne.s32.totalorder %s1286_s0, %s1122_s30  ;;  %p1126_p9 = scmp.lt.u32.totalorder %s1122_s30, %s1286_s0 }
  0x17   :  { %p1128_p10 = pnand %p1126_p9, %p1123_p8 }
  0x19   :  { %1131 = shalt.err (!%p1128_p10)
}
  0x1a   :  { %s1132_s8 = scalar_lea.vmem %s1222_s15, 256  ;;  %p1137_p12 = scmp.lt.s32.totalorder %s1222_s15, %s1222_s15 }
  0x1b   :  { %p1133_p11 = scmp.ne.s32.totalorder %s1222_s15, %s1132_s8  ;;  %p1138_p13 = scmp.lt.s32.totalorder %s1132_s8, %s1132_s8 }
  0x1d   :  { %p1139_p0 = por %p1138_p13, %p1137_p12 }
  0x1f   :  { %p1140_p1 = pnand %p1139_p0, %p1133_p11 }
  0x21   :  { %1143 = shalt.err (!%p1140_p1)
}
  0x22   :  { %22 = dma.hbm_to_vmem [thread:$0]  %s1286_s0, 256, %s1222_s15, [#allocation3], %s1196_s24, %s1196_s24, %s1197_s25  }
  0x23   :  { %s1198_s10 = smov [#allocation7]   ;;  %s1144_s14 = scalar_lea.hbm %s1288_s2, 4096 }
  0x24   :  { %s40_s11 = sshll.u32 %s1198_s10, 4  ;;  %p1145_p2 = scmp.ne.s32.totalorder %s1288_s2, %s1144_s14  ;;  %s41_s11 = int_to_ptr.vmem [resolvable:$true] %s40_s11 }
  0x25   :  { %p1148_p3 = scmp.lt.u32.totalorder %s1144_s14, %s1288_s2 }
  0x27   :  { %p1150_p4 = pnand %p1148_p3, %p1145_p2 }
  0x29   :  { %1153 = shalt.err (!%p1150_p4)
}
  0x2a   :  { %s1154_s20 = scalar_lea.vmem %s41_s11, 4096  ;;  %p1159_p6 = scmp.lt.s32.totalorder %s41_s11, %s41_s11 }
  0x2b   :  { %p1155_p5 = scmp.ne.s32.totalorder %s41_s11, %s1154_s20  ;;  %p1160_p7 = scmp.lt.s32.totalorder %s1154_s20, %s1154_s20 }
  0x2d   :  { %p1161_p8 = por %p1160_p7, %p1159_p6 }
  0x2f   :  { %p1162_p9 = pnand %p1161_p8, %p1155_p5 }
  0x31   :  { %1165 = shalt.err (!%p1162_p9)
}
  0x32   :  { %s1199_s0 = smov 256   ;;  %s1200_s15 = smov 16  }
  0x33   :  { %46 = dma.hbm_to_vmem [thread:$0]  %s1288_s2, 4096, %s41_s11, [#allocation6], %s1199_s0, %s1199_s0, %s1200_s15  }
  0x34   :  { %1188 = dma.done.wait [#allocation3], 256  }
  0x35   :  { %1189 = vsyncadd [#allocation3], 4294967040 }
  0x36   :  { %1190 = dma.done.wait [#allocation6], 12288  }
  0x37   :  { %1191 = vsyncadd [#allocation6], 4294955008  ;;  %v953_v0 = vld [vmem:[#allocation5 + $0x4] ss:$8 sps:$4 sm:$0xff]   ;;  %v957_v2 = vld [vmem:[#allocation5] ss:$8 sps:$4 sm:$0xff]  }
  0x38   :  { %v955_v1 = vld [vmem:[#allocation5 + $0x104] ss:$8 sps:$4 sm:$0xff]   ;;  %453 = vmatprep.subr.bf16.mxu0 %v953_v0  ;;  %v958_v3 = vld [vmem:[#allocation5 + $0x100] ss:$8 sps:$4 sm:$0xff]   ;;  %v959_v4 = vld [vmem:[#allocation5 + $0x14] ss:$8 sps:$4 sm:$0xff]  }
  0x39   :  { %496 = vmatprep.subr.bf16.mxu1 %v955_v1  ;;  %454 = vmatpush1.bf16.xpose.msra.mxu0 %v957_v2  ;;  %v961_v5 = vld [vmem:[#allocation5 + $0x114] ss:$8 sps:$4 sm:$0xff]   ;;  %v963_v6 = vld [vmem:[#allocation5 + $0x10] ss:$8 sps:$4 sm:$0xff]   ;;  %v965_v8 = vld [vmem:[#allocation5 + $0x24] ss:$8 sps:$4 sm:$0xff]  }
  0x3a   :  { %497 = vmatpush1.bf16.xpose.msra.mxu1 %v958_v3  ;;  %455 = vmatprep.subr.bf16.mxu0 %v959_v4  ;;  %v964_v7 = vld [vmem:[#allocation5 + $0x110] ss:$8 sps:$4 sm:$0xff]   ;;  %v967_v9 = vld [vmem:[#allocation5 + $0x124] ss:$8 sps:$4 sm:$0xff]   ;;  %v969_v10 = vld [vmem:[#allocation5 + $0x20] ss:$8 sps:$4 sm:$0xff]  }
  0x3b   :  { %498 = vmatprep.subr.bf16.mxu1 %v961_v5  ;;  %v970_v11 = vld [vmem:[#allocation5 + $0x120] ss:$8 sps:$4 sm:$0xff]   ;;  %v971_v12 = vld [vmem:[#allocation5 + $0x34] ss:$8 sps:$4 sm:$0xff]   ;;  %v975_v14 = vld [vmem:[#allocation5 + $0x30] ss:$8 sps:$4 sm:$0xff]  }
  0x3c   :  { %v973_v13 = vld [vmem:[#allocation5 + $0x134] ss:$8 sps:$4 sm:$0xff]   ;;  %v976_v15 = vld [vmem:[#allocation5 + $0x130] ss:$8 sps:$4 sm:$0xff]   ;;  %v977_v16 = vld [vmem:[#allocation5 + $0x44] ss:$8 sps:$4 sm:$0xff]  }
  0x3d   :  { %v979_v17 = vld [vmem:[#allocation5 + $0x144] ss:$8 sps:$4 sm:$0xff]   ;;  %v981_v18 = vld [vmem:[#allocation5 + $0x40] ss:$8 sps:$4 sm:$0xff]   ;;  %v983_v20 = vld [vmem:[#allocation5 + $0x54] ss:$8 sps:$4 sm:$0xff]  }
  0x3e   :  { %v982_v19 = vld [vmem:[#allocation5 + $0x140] ss:$8 sps:$4 sm:$0xff]   ;;  %v985_v21 = vld [vmem:[#allocation5 + $0x154] ss:$8 sps:$4 sm:$0xff]   ;;  %v987_v22 = vld [vmem:[#allocation5 + $0x50] ss:$8 sps:$4 sm:$0xff]  }
  0x3f   :  { %v988_v23 = vld [vmem:[#allocation5 + $0x150] ss:$8 sps:$4 sm:$0xff]   ;;  %v989_v24 = vld [vmem:[#allocation5 + $0x64] ss:$8 sps:$4 sm:$0xff]   ;;  %v1051_v26 = vld [vmem:[#allocation2 + $0x4] ss:$8 sps:$4 sm:$0xff]  }
  0x40   :  { %v991_v25 = vld [vmem:[#allocation5 + $0x164] ss:$8 sps:$4 sm:$0xff]   ;;  %485 = vmatprep.mubr.bf16.mxu0 %v1051_v26  ;;  %528 = vmatprep.mubr.bf16.mxu1 %v1051_v26  ;;  %v993_v27 = vld [vmem:[#allocation5 + $0x60] ss:$8 sps:$4 sm:$0xff]   ;;  %v995_v29 = vld [vmem:[#allocation5 + $0x74] ss:$8 sps:$4 sm:$0xff]  }
  0x41   :  { %456 = vmatpush1.bf16.xpose.msra.mxu0 %v963_v6  ;;  %v994_v28 = vld [vmem:[#allocation5 + $0x160] ss:$8 sps:$4 sm:$0xff]   ;;  %v997_v30 = vld [vmem:[#allocation5 + $0x174] ss:$8 sps:$4 sm:$0xff]   ;;  %v999_v31 = vld [vmem:[#allocation5 + $0x70] ss:$8 sps:$4 sm:$0xff]  }
  0x42   :  { %499 = vmatpush1.bf16.xpose.msra.mxu1 %v964_v7  ;;  %457 = vmatprep.subr.bf16.mxu0 %v965_v8  ;;  %v1000_v32 = vld [vmem:[#allocation5 + $0x170] ss:$8 sps:$4 sm:$0xff]   ;;  %v1001_v33 = vld [vmem:[#allocation5 + $0x84] ss:$8 sps:$4 sm:$0xff]   ;;  %v1005_v35 = vld [vmem:[#allocation5 + $0x80] ss:$8 sps:$4 sm:$0xff]  }
  0x43   :  { %500 = vmatprep.subr.bf16.mxu1 %v967_v9  ;;  %v1003_v34 = vld [vmem:[#allocation5 + $0x184] ss:$8 sps:$4 sm:$0xff]   ;;  %v1006_v36 = vld [vmem:[#allocation5 + $0x180] ss:$8 sps:$4 sm:$0xff]   ;;  %v1007_v37 = vld [vmem:[#allocation5 + $0x94] ss:$8 sps:$4 sm:$0xff]  }
  0x44   :  { %v1009_v38 = vld [vmem:[#allocation5 + $0x194] ss:$8 sps:$4 sm:$0xff]   ;;  %v1011_v39 = vld [vmem:[#allocation5 + $0x90] ss:$8 sps:$4 sm:$0xff]   ;;  %v1013_v41 = vld [vmem:[#allocation5 + $0xa4] ss:$8 sps:$4 sm:$0xff]  }
  0x45   :  { %v1012_v40 = vld [vmem:[#allocation5 + $0x190] ss:$8 sps:$4 sm:$0xff]   ;;  %v1015_v42 = vld [vmem:[#allocation5 + $0x1a4] ss:$8 sps:$4 sm:$0xff]   ;;  %v1017_v43 = vld [vmem:[#allocation5 + $0xa0] ss:$8 sps:$4 sm:$0xff]  }
  0x46   :  { %v1018_v44 = vld [vmem:[#allocation5 + $0x1a0] ss:$8 sps:$4 sm:$0xff]   ;;  %v1019_v45 = vld [vmem:[#allocation5 + $0xb4] ss:$8 sps:$4 sm:$0xff]   ;;  %v1023_v47 = vld [vmem:[#allocation5 + $0xb0] ss:$8 sps:$4 sm:$0xff]  }
  0x47   :  { %v1021_v46 = vld [vmem:[#allocation5 + $0x1b4] ss:$8 sps:$4 sm:$0xff]   ;;  %v1024_v48 = vld [vmem:[#allocation5 + $0x1b0] ss:$8 sps:$4 sm:$0xff]   ;;  %v1025_v49 = vld [vmem:[#allocation5 + $0xc4] ss:$8 sps:$4 sm:$0xff]  }
  0x48   :  { %v1027_v50 = vld [vmem:[#allocation5 + $0x1c4] ss:$8 sps:$4 sm:$0xff]   ;;  %v1029_v51 = vld [vmem:[#allocation5 + $0xc0] ss:$8 sps:$4 sm:$0xff]   ;;  %v1031_v53 = vld [vmem:[#allocation5 + $0xd4] ss:$8 sps:$4 sm:$0xff]  }
  0x49   :  { %458 = vmatpush1.bf16.xpose.msra.mxu0 %v969_v10  ;;  %v1030_v52 = vld [vmem:[#allocation5 + $0x1c0] ss:$8 sps:$4 sm:$0xff]   ;;  %v1033_v54 = vld [vmem:[#allocation5 + $0x1d4] ss:$8 sps:$4 sm:$0xff]   ;;  %v1035_v55 = vld [vmem:[#allocation5 + $0xd0] ss:$8 sps:$4 sm:$0xff]  }
  0x4a   :  { %501 = vmatpush1.bf16.xpose.msra.mxu1 %v970_v11  ;;  %459 = vmatprep.subr.bf16.mxu0 %v971_v12  ;;  %v1036_v56 = vld [vmem:[#allocation5 + $0x1d0] ss:$8 sps:$4 sm:$0xff]   ;;  %v1037_v57 = vld [vmem:[#allocation5 + $0xe4] ss:$8 sps:$4 sm:$0xff]   ;;  %v1041_v59 = vld [vmem:[#allocation5 + $0xe0] ss:$8 sps:$4 sm:$0xff]  }
  0x4b   :  { %502 = vmatprep.subr.bf16.mxu1 %v973_v13  ;;  %v1039_v58 = vld [vmem:[#allocation5 + $0x1e4] ss:$8 sps:$4 sm:$0xff]   ;;  %v1042_v60 = vld [vmem:[#allocation5 + $0x1e0] ss:$8 sps:$4 sm:$0xff]   ;;  %v1043_v61 = vld [vmem:[#allocation5 + $0xf4] ss:$8 sps:$4 sm:$0xff]  }
  0x4c   :  { %v1045_v62 = vld [vmem:[#allocation5 + $0x1f4] ss:$8 sps:$4 sm:$0xff]   ;;  %v1047_v63 = vld [vmem:[#allocation5 + $0xf0] ss:$8 sps:$4 sm:$0xff]   ;;  %s1201_s2 = smov [#allocation8]  }
  0x4d   :  { %v1048_v0 = vld [vmem:[#allocation5 + $0x1f0] ss:$8 sps:$4 sm:$0xff]   ;;  %v1054_v1 = vld [vmem:[#allocation7 + $0x4] ss:$16 sps:$4 sm:$0xff]   ;;  %v1057_v2 = vld [vmem:[#allocation7 + $0xc] ss:$16 sps:$4 sm:$0xff]  }
  0x4e   :  { %v1049_v3 = vld [vmem:[#allocation2] ss:$8 sps:$4 sm:$0xff]   ;;  %v1060_v6 = vld [vmem:[#allocation7 + $0x24] ss:$16 sps:$4 sm:$0xff]   ;;  %v1063_v7 = vld [vmem:[#allocation7 + $0x2c] ss:$16 sps:$4 sm:$0xff]  }
  0x4f   :  { %v1052_v4 = vld [vmem:[#allocation7] ss:$16 sps:$4 sm:$0xff]   ;;  %v1055_v5 = vld [vmem:[#allocation7 + $0x8] ss:$16 sps:$4 sm:$0xff]   ;;  %v1066_v10 = vld [vmem:[#allocation7 + $0x44] ss:$16 sps:$4 sm:$0xff]  }
  0x50   :  { %v1058_v8 = vld [vmem:[#allocation7 + $0x20] ss:$16 sps:$4 sm:$0xff]   ;;  %v1061_v9 = vld [vmem:[#allocation7 + $0x28] ss:$16 sps:$4 sm:$0xff]   ;;  %v1069_v11 = vld [vmem:[#allocation7 + $0x4c] ss:$16 sps:$4 sm:$0xff]  }
  0x51   :  { %460 = vmatpush1.bf16.xpose.msra.mxu0 %v975_v14  ;;  %v1064_v12 = vld [vmem:[#allocation7 + $0x40] ss:$16 sps:$4 sm:$0xff]   ;;  %v1067_v13 = vld [vmem:[#allocation7 + $0x48] ss:$16 sps:$4 sm:$0xff]   ;;  %v1072_v14 = vld [vmem:[#allocation7 + $0x64] ss:$16 sps:$4 sm:$0xff]  }
  0x52   :  { %503 = vmatpush1.bf16.xpose.msra.mxu1 %v976_v15  ;;  %461 = vmatprep.subr.bf16.mxu0 %v977_v16  ;;  %v1075_v15 = vld [vmem:[#allocation7 + $0x6c] ss:$16 sps:$4 sm:$0xff]   ;;  %v1070_v16 = vld [vmem:[#allocation7 + $0x60] ss:$16 sps:$4 sm:$0xff]   ;;  %v1090_v26 = vld [vmem:[#allocation7 + $0xc4] ss:$16 sps:$4 sm:$0xff]  }
  0x53   :  { %504 = vmatprep.subr.bf16.mxu1 %v979_v17  ;;  %v1073_v17 = vld [vmem:[#allocation7 + $0x68] ss:$16 sps:$4 sm:$0xff]   ;;  %s832_s23 = sshll.u32 %s1201_s2, 4  ;;  %s833_s23 = int_to_ptr.vmem [resolvable:$true] %s832_s23 }
  0x54   :  { %s1166_s26 = scalar_lea.vmem %s833_s23, 256  ;;  %p1171_p11 = scmp.lt.s32.totalorder %s833_s23, %s833_s23 }
  0x55   :  { %p1167_p10 = scmp.ne.s32.totalorder %s833_s23, %s1166_s26  ;;  %p1172_p12 = scmp.lt.s32.totalorder %s1166_s26, %s1166_s26 }
  0x57   :  { %p1173_p13 = por %p1172_p12, %p1171_p11 }
  0x59   :  { %462 = vmatpush1.bf16.xpose.msra.mxu0 %v981_v18  ;;  %v1078_v18 = vld [vmem:[#allocation7 + $0x84] ss:$16 sps:$4 sm:$0xff]   ;;  %p1174_p0 = pnand %p1173_p13, %p1167_p10 }
  0x5a   :  { %505 = vmatpush1.bf16.xpose.msra.mxu1 %v982_v19  ;;  %463 = vmatprep.subr.bf16.mxu0 %v983_v20  ;;  %v1081_v19 = vld [vmem:[#allocation7 + $0x8c] ss:$16 sps:$4 sm:$0xff]   ;;  %v1076_v20 = vld [vmem:[#allocation7 + $0x80] ss:$16 sps:$4 sm:$0xff]  }
  0x5b   :  { %506 = vmatprep.subr.bf16.mxu1 %v985_v21  ;;  %v1079_v21 = vld [vmem:[#allocation7 + $0x88] ss:$16 sps:$4 sm:$0xff]  }
  0x61   :  { %464 = vmatpush1.bf16.xpose.msra.mxu0 %v987_v22  ;;  %v1084_v22 = vld [vmem:[#allocation7 + $0xa4] ss:$16 sps:$4 sm:$0xff]  }
  0x62   :  { %507 = vmatpush1.bf16.xpose.msra.mxu1 %v988_v23  ;;  %465 = vmatprep.subr.bf16.mxu0 %v989_v24  ;;  %v1087_v23 = vld [vmem:[#allocation7 + $0xac] ss:$16 sps:$4 sm:$0xff]   ;;  %v1082_v24 = vld [vmem:[#allocation7 + $0xa0] ss:$16 sps:$4 sm:$0xff]  }
  0x63   :  { %508 = vmatprep.subr.bf16.mxu1 %v991_v25  ;;  %v1085_v25 = vld [vmem:[#allocation7 + $0xa8] ss:$16 sps:$4 sm:$0xff]  }
  0x69   :  { %466 = vmatpush1.bf16.xpose.msra.mxu0 %v993_v27  ;;  %v1093_v27 = vld [vmem:[#allocation7 + $0xcc] ss:$16 sps:$4 sm:$0xff]  }
  0x6a   :  { %509 = vmatpush1.bf16.xpose.msra.mxu1 %v994_v28  ;;  %467 = vmatprep.subr.bf16.mxu0 %v995_v29  ;;  %v1088_v28 = vld [vmem:[#allocation7 + $0xc0] ss:$16 sps:$4 sm:$0xff]   ;;  %v1091_v29 = vld [vmem:[#allocation7 + $0xc8] ss:$16 sps:$4 sm:$0xff]  }
  0x6b   :  { %510 = vmatprep.subr.bf16.mxu1 %v997_v30  ;;  %v1096_v30 = vld [vmem:[#allocation7 + $0xe4] ss:$16 sps:$4 sm:$0xff]  }
  0x71   :  { %468 = vmatpush1.bf16.xpose.msra.mxu0 %v999_v31  ;;  %v1099_v31 = vld [vmem:[#allocation7 + $0xec] ss:$16 sps:$4 sm:$0xff]  }
  0x72   :  { %511 = vmatpush1.bf16.xpose.msra.mxu1 %v1000_v32  ;;  %469 = vmatprep.subr.bf16.mxu0 %v1001_v33  ;;  %v1094_v32 = vld [vmem:[#allocation7 + $0xe0] ss:$16 sps:$4 sm:$0xff]   ;;  %v1097_v33 = vld [vmem:[#allocation7 + $0xe8] ss:$16 sps:$4 sm:$0xff]  }
  0x73   :  { %512 = vmatprep.subr.bf16.mxu1 %v1003_v34 }
  0x79   :  { %470 = vmatpush1.bf16.xpose.msra.mxu0 %v1005_v35 }
  0x7a   :  { %513 = vmatpush1.bf16.xpose.msra.mxu1 %v1006_v36  ;;  %471 = vmatprep.subr.bf16.mxu0 %v1007_v37 }
  0x7b   :  { %514 = vmatprep.subr.bf16.mxu1 %v1009_v38 }
  0x81   :  { %472 = vmatpush1.bf16.xpose.msra.mxu0 %v1011_v39 }
  0x82   :  { %515 = vmatpush1.bf16.xpose.msra.mxu1 %v1012_v40  ;;  %473 = vmatprep.subr.bf16.mxu0 %v1013_v41 }
  0x83   :  { %516 = vmatprep.subr.bf16.mxu1 %v1015_v42 }
  0x89   :  { %474 = vmatpush1.bf16.xpose.msra.mxu0 %v1017_v43 }
  0x8a   :  { %517 = vmatpush1.bf16.xpose.msra.mxu1 %v1018_v44  ;;  %475 = vmatprep.subr.bf16.mxu0 %v1019_v45 }
  0x8b   :  { %518 = vmatprep.subr.bf16.mxu1 %v1021_v46 }
  0x91   :  { %476 = vmatpush1.bf16.xpose.msra.mxu0 %v1023_v47 }
  0x92   :  { %519 = vmatpush1.bf16.xpose.msra.mxu1 %v1024_v48  ;;  %477 = vmatprep.subr.bf16.mxu0 %v1025_v49 }
  0x93   :  { %520 = vmatprep.subr.bf16.mxu1 %v1027_v50 }
  0x99   :  { %478 = vmatpush1.bf16.xpose.msra.mxu0 %v1029_v51 }
  0x9a   :  { %521 = vmatpush1.bf16.xpose.msra.mxu1 %v1030_v52  ;;  %479 = vmatprep.subr.bf16.mxu0 %v1031_v53 }
  0x9b   :  { %522 = vmatprep.subr.bf16.mxu1 %v1033_v54 }
  0xa1   :  { %480 = vmatpush1.bf16.xpose.msra.mxu0 %v1035_v55 }
  0xa2   :  { %523 = vmatpush1.bf16.xpose.msra.mxu1 %v1036_v56  ;;  %481 = vmatprep.subr.bf16.mxu0 %v1037_v57 }
  0xa3   :  { %524 = vmatprep.subr.bf16.mxu1 %v1039_v58 }
  0xa9   :  { %482 = vmatpush1.bf16.xpose.msra.mxu0 %v1041_v59 }
  0xaa   :  { %525 = vmatpush1.bf16.xpose.msra.mxu1 %v1042_v60  ;;  %483 = vmatprep.subr.bf16.mxu0 %v1043_v61 }
  0xab   :  { %526 = vmatprep.subr.bf16.mxu1 %v1045_v62 }
  0xb1   :  { %484 = vmatpush1.bf16.xpose.msra.mxu0 %v1047_v63 }
  0xb2   :  { %527 = vmatpush1.bf16.xpose.msra.mxu1 %v1048_v0  ;;  %784 = vmatprep.subr.bf16.mxu0 %v1057_v2 }
  0xb3   :  { %743 = vmatprep.subr.bf16.mxu1 %v1054_v1 }
  0xb8   :  { %486 = vmatmul.mubr.bf16.vlgmr.msra.gmra.mrb[0].mxu0 %v1049_v3 }
  0xb9   :  { %529 = vmatmul.mubr.bf16.vlgmr.msra.gmra.mrb[0].mxu1 %v1049_v3  ;;  %785 = vmatpush1.bf16.xpose.msra.mxu0 %v1055_v5 }
  0xba   :  { %744 = vmatpush1.bf16.xpose.msra.mxu1 %v1052_v4  ;;  %786 = vmatprep.subr.bf16.mxu0 %v1063_v7 }
  0xbb   :  { %745 = vmatprep.subr.bf16.mxu1 %v1060_v6 }
  0xc1   :  { %787 = vmatpush1.bf16.xpose.msra.mxu0 %v1061_v9 }
  0xc2   :  { %746 = vmatpush1.bf16.xpose.msra.mxu1 %v1058_v8  ;;  %788 = vmatprep.subr.bf16.mxu0 %v1069_v11 }
  0xc3   :  { %747 = vmatprep.subr.bf16.mxu1 %v1066_v10 }
  0xc9   :  { %789 = vmatpush1.bf16.xpose.msra.mxu0 %v1067_v13 }
  0xca   :  { %748 = vmatpush1.bf16.xpose.msra.mxu1 %v1064_v12  ;;  %790 = vmatprep.subr.bf16.mxu0 %v1075_v15 }
  0xcb   :  { %749 = vmatprep.subr.bf16.mxu1 %v1072_v14 }
  0xd1   :  { %791 = vmatpush1.bf16.xpose.msra.mxu0 %v1073_v17 }
  0xd2   :  { %750 = vmatpush1.bf16.xpose.msra.mxu1 %v1070_v16  ;;  %792 = vmatprep.subr.bf16.mxu0 %v1081_v19 }
  0xd3   :  { %751 = vmatprep.subr.bf16.mxu1 %v1078_v18 }
  0xd9   :  { %793 = vmatpush1.bf16.xpose.msra.mxu0 %v1079_v21 }
  0xda   :  { %752 = vmatpush1.bf16.xpose.msra.mxu1 %v1076_v20  ;;  %794 = vmatprep.subr.bf16.mxu0 %v1087_v23 }
  0xdb   :  { %753 = vmatprep.subr.bf16.mxu1 %v1084_v22 }
  0xe1   :  { %795 = vmatpush1.bf16.xpose.msra.mxu0 %v1085_v25 }
  0xe2   :  { %754 = vmatpush1.bf16.xpose.msra.mxu1 %v1082_v24  ;;  %796 = vmatprep.subr.bf16.mxu0 %v1093_v27 }
  0xe3   :  { %755 = vmatprep.subr.bf16.mxu1 %v1090_v26 }
  0xe9   :  { %797 = vmatpush1.bf16.xpose.msra.mxu0 %v1091_v29 }
  0xea   :  { %756 = vmatpush1.bf16.xpose.msra.mxu1 %v1088_v28  ;;  %798 = vmatprep.subr.bf16.mxu0 %v1099_v31 }
  0xeb   :  { %757 = vmatprep.subr.bf16.mxu1 %v1096_v30 }
  0xf1   :  { %799 = vmatpush1.bf16.xpose.msra.mxu0 %v1097_v33 }
  0xf2   :  { %758 = vmatpush1.bf16.xpose.msra.mxu1 %v1094_v32 }
 0x18b   :  { %v487_v34 = vpop.f32.mrb[0].mxu0 }
 0x18c   :  { %v530_v35 = vpop.f32.mrb[0].mxu1  ;;  %v489_v36 = vpop.f32.mrb[1].mxu0  ;;  %v539_v40 = vmax.f32 %v487_v34, 0.0 }
 0x18d   :  { %v532_v37 = vpop.f32.mrb[1].mxu1  ;;  %v491_v38 = vpop.f32.mrb[2].mxu0  ;;  %v541_v41 = vmax.f32 %v530_v35, 0.0  ;;  %v540_v46 = vmax.f32 %v489_v36, 0.0 }
 0x18e   :  { %v534_v39 = vpop.f32.mrb[2].mxu1  ;;  %v543_v42 = vmax.f32 %v491_v38, 0.0  ;;  %v493_v44 = vpop.f32.mrb[3].mxu0  ;;  %v542_v47 = vmax.f32 %v532_v37, 0.0 }
 0x18f   :  { %v545_v43 = vmax.f32 %v534_v39, 0.0  ;;  %v536_v45 = vpop.f32.mrb[3].mxu1  ;;  %v544_v48 = vmax.f32 %v493_v44, 0.0 }
 0x190   :  { %v546_v49 = vmax.f32 %v536_v45, 0.0  ;;  %v547_v50 = vpack.c.bf16 %v543_v42, %v539_v40 }
 0x191   :  { %v549_v51 = vpack.c.bf16 %v545_v43, %v541_v41  ;;  %v548_v52 = vpack.c.bf16 %v544_v48, %v540_v46 }
 0x192   :  { %v550_v53 = vpack.c.bf16 %v546_v49, %v542_v47 }
 0x193   :  { %775 = vmatprep.mubr.bf16.mxu1 %v548_v52 }
 0x194   :  { %816 = vmatprep.mubr.bf16.mxu0 %v550_v53  ;;  %776 = vmatmul.mubr.bf16.vlgmr.msra.gmra.mrb[4].mxu1 %v547_v50 }
 0x195   :  { %817 = vmatmul.mubr.bf16.vlgmr.msra.gmra.mrb[4].mxu0 %v549_v51 }
 0x267   :  { %v777_v54 = vpop.f32.mrb[4].mxu1 }
 0x268   :  { %v818_v55 = vpop.f32.mrb[4].mxu0  ;;  %v779_v57 = vpop.f32.mrb[5].mxu1 }
 0x269   :  { %v819_v56 = vadd.f32 %v818_v55, %v777_v54  ;;  %v820_v58 = vpop.f32.mrb[5].mxu0  ;;  %v780_v59 = vpop.f32.mrb[6].mxu1 }
 0x26a   :  { %v821_v60 = vpop.f32.mrb[6].mxu0  ;;  %v782_v62 = vpop.f32.mrb[7].mxu1 }
 0x26b   :  { %825 = vst [vmem:[#allocation8] sm:$0xff] %v819_v56  ;;  %v822_v61 = vadd.f32 %v821_v60, %v780_v59  ;;  %v823_v63 = vpop.f32.mrb[7].mxu0 }
 0x26d   :  { %826 = vst [vmem:[#allocation8 + $0x8] sm:$0xff] %v822_v61 }
 0x26e   :  { %1177 = shalt.err (!%p1174_p0)
}
 0x26f   :  { %s1178_s29 = scalar_lea.hbm %s1289_s3, 256 }
 0x270   :  { %p1179_p1 = scmp.ne.s32.totalorder %s1289_s3, %s1178_s29  ;;  %p1182_p2 = scmp.lt.u32.totalorder %s1178_s29, %s1289_s3 }
 0x272   :  { %p1184_p3 = pnand %p1182_p2, %p1179_p1 }
 0x274   :  { %1187 = shalt.err (!%p1184_p3)
}
 0x275   :  { %838 = dma.vmem_to_hbm [thread:$0]  %s833_s23, 256, %s1289_s3, [#allocation4], %s1196_s24, %s1196_s24, %s1197_s25  }
 0x276   :  { %1192 = dma.done.wait [#allocation4], 256  }
 0x277   :  { %1193 = vsyncadd [#allocation4], 4294967040 }
 0x278   :  { %842 = vsyncpa [#allocation3], 1 }
 0x279   :  { %843 = vsyncpa [#allocation6], 1 }
 0x27a   :  { %844 = vsyncpa [#allocation4], 1 }

</bundles_post_ra>
